<compile_context>
chip_gen: v7x
topology: tpu7x:2x2x1
jax: 0.10.0
libtpu: 0.0.40
codegen_flags: <defaults>
</compile_context>

<pallas_src>
import math

import jax
import jax.numpy as jnp
from jax.experimental import pallas as pl
from jax.experimental.pallas import tpu as pltpu


def _sad_loss_kernel(x1_ref, x2_ref, out_ref, s1_acc, s2_acc):
    c = pl.program_id(1)
    nc = pl.num_programs(1)

    # (TB, TC, HW) blocks; upcast once.
    x1 = x1_ref[...].astype(jnp.float32)
    x2 = x2_ref[...].astype(jnp.float32)

    # Channel-tile energy: sum over the channel sub-axis -> (TB, HW).
    e1 = jnp.sum(x1 * x1, axis=1)
    e2 = jnp.sum(x2 * x2, axis=1)

    @pl.when(c == 0)
    def _():
        s1_acc[...] = e1
        s2_acc[...] = e2

    @pl.when(c > 0)
    def _():
        s1_acc[...] += e1
        s2_acc[...] += e2

    @pl.when(c == nc - 1)
    def _():
        def _softmax_last(s):
            m = jnp.max(s, axis=-1, keepdims=True)
            e = jnp.exp(s - m)
            # approx=False keeps the loss within tight tolerances vs. jax.nn.softmax.
            return e * pl.reciprocal(jnp.sum(e, axis=-1, keepdims=True), approx=False)

        p1 = _softmax_last(s1_acc[...])
        p2 = _softmax_last(s2_acc[...])
        d = p1 - p2
        partial = jnp.sum(d * d, axis=-1, keepdims=True)            # (TB, 1)
        # Lane-dense (TB, 1, 128) store; wrapper reads column 0.
        out_ref[...] = jnp.broadcast_to(partial[:, :, None], out_ref.shape).astype(
            out_ref.dtype
        )


def _divisors(n):
    return [d for d in range(1, n + 1) if n % d == 0]


def _pick_tiles(B, C1, C2, HW, itemsize, budget_bytes):
    """Return (TB, TC1, TC2, NC) tile sizes respecting the VMEM budget.

    Budget accounts for double-buffered input blocks: 2 * TB * (TC1+TC2) * HW * itemsize.
    """

    def step_bytes(tb, tc1, tc2):
        return 2 * tb * (tc1 + tc2) * HW * itemsize

    if step_bytes(1, C1, C2) <= budget_bytes:
        # Whole channel dim fits in one block; grow the batch tile to amortize
        # the ~0.35us per-grid-step overhead for small slabs.
        tb = 1
        for d in _divisors(B):
            if step_bytes(d, C1, C2) <= budget_bytes:
                tb = d
        return tb, C1, C2, 1

    # Tile the channel dim as a reduction grid axis.  Channel tiles must be a
    # multiple of 8 (sublane rule) unless they cover the full channel dim.
    g = math.gcd(C1, C2)
    best = None
    for nc in _divisors(g):
        tc1, tc2 = C1 // nc, C2 // nc
        layout_ok = (nc == 1) or (tc1 % 8 == 0 and tc2 % 8 == 0)
        if not layout_ok:
            continue
        best = (1, tc1, tc2, nc)
        if step_bytes(1, tc1, tc2) <= budget_bytes:
            return best
    return best  # smallest valid tiles (budget may be exceeded for awkward C)


def sad_loss(x1, x2, *, input_vmem_budget_bytes=16 * 1024 * 1024):
    """Pallas implementation of sadLoss.forward([x1, x2]) -> scalar f32."""
    B, C1, H, W = x1.shape
    B2, C2, H2, W2 = x2.shape
    assert B == B2 and H == H2 and W == W2, "batch/spatial dims must match for MSE"
    HW = H * W

    x1f = x1.reshape(B, C1, HW)
    x2f = x2.reshape(B, C2, HW)

    itemsize = jnp.dtype(x1.dtype).itemsize
    TB, TC1, TC2, NC = _pick_tiles(B, C1, C2, HW, itemsize, input_vmem_budget_bytes)
    assert B % TB == 0 and C1 % TC1 == 0 and C2 % TC2 == 0

    # Explicit VMEM limit: computed footprint + headroom, floor of 32 MiB
    # (safe default on v5e/v6e/v7x since tiles target <=16 MiB of inputs).
    step_in = 2 * TB * (TC1 + TC2) * HW * itemsize
    scratch_b = 2 * TB * HW * 4
    out_b = 2 * TB * 128 * 4
    vmem_limit = int(min(100 * 2**20, max(32 * 2**20, step_in + scratch_b + out_b + 2 * 2**20)))

    acc = pl.pallas_call(
        _sad_loss_kernel,
        out_shape=jax.ShapeDtypeStruct((B, 1, 128), jnp.float32),
        grid_spec=pltpu.PrefetchScalarGridSpec(
            num_scalar_prefetch=0,
            grid=(B // TB, NC),
            in_specs=[
                pl.BlockSpec((TB, TC1, HW), lambda b, c: (b, c, 0)),
                pl.BlockSpec((TB, TC2, HW), lambda b, c: (b, c, 0)),
            ],
            out_specs=pl.BlockSpec((TB, 1, 128), lambda b, c: (b, 0, 0)),
            scratch_shapes=[
                pltpu.VMEM((TB, HW), jnp.float32),
                pltpu.VMEM((TB, HW), jnp.float32),
            ],
        ),
        compiler_params=pltpu.CompilerParams(
            # Batch axis is independent (per-batch output rows) -> megacore parallel.
            # Channel axis carries the energy scratch -> arbitrary.
            dimension_semantics=("parallel", "arbitrary"),
            vmem_limit_bytes=vmem_limit,
        ),
    )(x1f, x2f)

    # MSELoss(reduction='mean') over tensors of shape (B, 1, H*W).
    total = jnp.sum(acc[:, 0, 0])
    return (total / jnp.float32(B * HW)).astype(jnp.float32)


def _sad_loss_ref(x1, x2):
    """Pure-JAX reference mirroring the PyTorch module."""
    B, _, H, W = x1.shape
    e1 = jnp.sum(x1.astype(jnp.float32) ** 2, axis=1).reshape(B, 1, H * W)
    e2 = jnp.sum(x2.astype(jnp.float32) ** 2, axis=1).reshape(B, 1, H * W)
    p1 = jax.nn.softmax(e1, axis=-1)
    p2 = jax.nn.softmax(e2, axis=-1)
    return jnp.mean((p1 - p2) ** 2)


if __name__ == "__main__":
    key = jax.random.PRNGKey(0)
    k1, k2, k3, k4 = jax.random.split(key, 4)

    # Small shapes consistent with the forward: two NCHW feature maps.
    B, C, H, W = 2, 4, 16, 16
    x1 = jax.random.normal(k1, (B, C, H, W), dtype=jnp.float32)
    x2 = jax.random.normal(k2, (B, C, H, W), dtype=jnp.float32)

    loss = jax.block_until_ready(sad_loss(x1, x2))
    ref = jax.block_until_ready(_sad_loss_ref(x1, x2))
    assert loss.shape == (), f"expected scalar, got {loss.shape}"
    assert jnp.allclose(loss, ref, rtol=1e-5, atol=1e-7), (loss, ref)

    # Second small case with a tiny VMEM budget to exercise the channel-tiled
    # (reduction grid axis + energy scratch) code path.
    B2_, C2_, H2_, W2_ = 2, 16, 16, 16
    y1 = jax.random.normal(k3, (B2_, C2_, H2_, W2_), dtype=jnp.float32)
    y2 = jax.random.normal(k4, (B2_, C2_, H2_, W2_), dtype=jnp.float32)
    loss2 = jax.block_until_ready(sad_loss(y1, y2, input_vmem_budget_bytes=40 * 1024))
    ref2 = jax.block_until_ready(_sad_loss_ref(y1, y2))
    assert jnp.allclose(loss2, ref2, rtol=1e-5, atol=1e-7), (loss2, ref2)

    print("KERNEL_OK")
</pallas_src>

<mosaic_0001>
module attributes {stable_mosaic.version = 11 : i64} {
  func.func @_sad_loss_kernel(%arg0: i32, %arg1: i32, %arg2: memref<2x4x256xf32, #tpu.memory_space<vmem>>, %arg3: memref<2x4x256xf32, #tpu.memory_space<vmem>>, %arg4: memref<2x1x128xf32, #tpu.memory_space<vmem>>, %arg5: memref<2x256xf32, #tpu.memory_space<vmem>>, %arg6: memref<2x256xf32, #tpu.memory_space<vmem>>) attributes {dimension_semantics = [#tpu.dimension_semantics<parallel>, #tpu.dimension_semantics<arbitrary>], iteration_bounds = array<i64: 1, 1>, scalar_prefetch = 0 : i64, scratch_operands = 2 : i64, tpu.core_type = #tpu.core_type<tc>, window_params = [{transform_indices = @transform_0, window_bounds = array<i64: 2, 4, 256>}, {transform_indices = @transform_1, window_bounds = array<i64: 2, 4, 256>}, {transform_indices = @transform_2, window_bounds = array<i64: 2, 1, 128>}]} {
    %c0 = arith.constant 0 : index
    %c0_0 = arith.constant 0 : index
    %c0_1 = arith.constant 0 : index
    %0 = vector.load %arg2[%c0, %c0_0, %c0_1] : memref<2x4x256xf32, #tpu.memory_space<vmem>>, vector<2x4x256xf32>
    %c0_2 = arith.constant 0 : index
    %c0_3 = arith.constant 0 : index
    %c0_4 = arith.constant 0 : index
    %1 = vector.load %arg3[%c0_2, %c0_3, %c0_4] : memref<2x4x256xf32, #tpu.memory_space<vmem>>, vector<2x4x256xf32>
    %2 = arith.mulf %0, %0 : vector<2x4x256xf32>
    %cst = arith.constant dense<0.000000e+00> : vector<2x256xf32>
    %3 = vector.multi_reduction <add>, %2, %cst [1] : vector<2x4x256xf32> to vector<2x256xf32>
    %4 = arith.mulf %1, %1 : vector<2x4x256xf32>
    %cst_5 = arith.constant dense<0.000000e+00> : vector<2x256xf32>
    %5 = vector.multi_reduction <add>, %4, %cst_5 [1] : vector<2x4x256xf32> to vector<2x256xf32>
    %c0_i32 = arith.constant 0 : i32
    %6 = arith.cmpi eq, %arg1, %c0_i32 : i32
    %7 = arith.extui %6 : i1 to i32
    %c0_i32_6 = arith.constant 0 : i32
    %8 = arith.cmpi ne, %7, %c0_i32_6 : i32
    scf.if %8 {
      %c0_11 = arith.constant 0 : index
      %c0_12 = arith.constant 0 : index
      %15 = vector.load %arg5[%c0_11, %c0_12] : memref<2x256xf32, #tpu.memory_space<vmem>>, vector<2x256xf32>
      tpu.vector_store %arg5[%c0_11, %c0_12], %3 {strides = array<i32>} : memref<2x256xf32, #tpu.memory_space<vmem>>, vector<2x256xf32>,
      %c0_13 = arith.constant 0 : index
      %c0_14 = arith.constant 0 : index
      %16 = vector.load %arg6[%c0_13, %c0_14] : memref<2x256xf32, #tpu.memory_space<vmem>>, vector<2x256xf32>
      tpu.vector_store %arg6[%c0_13, %c0_14], %5 {strides = array<i32>} : memref<2x256xf32, #tpu.memory_space<vmem>>, vector<2x256xf32>,
    } else {
    }
    %c0_i32_7 = arith.constant 0 : i32
    %9 = arith.cmpi sgt, %arg1, %c0_i32_7 : i32
    %10 = arith.extui %9 : i1 to i32
    %c0_i32_8 = arith.constant 0 : i32
    %11 = arith.cmpi ne, %10, %c0_i32_8 : i32
    scf.if %11 {
      %c0_11 = arith.constant 0 : index
      %c0_12 = arith.constant 0 : index
      %15 = vector.load %arg5[%c0_11, %c0_12] : memref<2x256xf32, #tpu.memory_space<vmem>>, vector<2x256xf32>
      %16 = arith.addf %15, %3 : vector<2x256xf32>
      %c0_13 = arith.constant 0 : index
      %c0_14 = arith.constant 0 : index
      %17 = vector.load %arg5[%c0_13, %c0_14] : memref<2x256xf32, #tpu.memory_space<vmem>>, vector<2x256xf32>
      tpu.vector_store %arg5[%c0_13, %c0_14], %16 {strides = array<i32>} : memref<2x256xf32, #tpu.memory_space<vmem>>, vector<2x256xf32>,
      %c0_15 = arith.constant 0 : index
      %c0_16 = arith.constant 0 : index
      %18 = vector.load %arg6[%c0_15, %c0_16] : memref<2x256xf32, #tpu.memory_space<vmem>>, vector<2x256xf32>
      %19 = arith.addf %18, %5 : vector<2x256xf32>
      %c0_17 = arith.constant 0 : index
      %c0_18 = arith.constant 0 : index
      %20 = vector.load %arg6[%c0_17, %c0_18] : memref<2x256xf32, #tpu.memory_space<vmem>>, vector<2x256xf32>
      tpu.vector_store %arg6[%c0_17, %c0_18], %19 {strides = array<i32>} : memref<2x256xf32, #tpu.memory_space<vmem>>, vector<2x256xf32>,
    } else {
    }
    %c0_i32_9 = arith.constant 0 : i32
    %12 = arith.cmpi eq, %arg1, %c0_i32_9 : i32
    %13 = arith.extui %12 : i1 to i32
    %c0_i32_10 = arith.constant 0 : i32
    %14 = arith.cmpi ne, %13, %c0_i32_10 : i32
    scf.if %14 {
      %c0_11 = arith.constant 0 : index
      %c0_12 = arith.constant 0 : index
      %15 = vector.load %arg5[%c0_11, %c0_12] : memref<2x256xf32, #tpu.memory_space<vmem>>, vector<2x256xf32>
      %cst_13 = arith.constant dense<0xFF800000> : vector<2xf32>
      %16 = vector.multi_reduction <maximumf>, %15, %cst_13 [1] : vector<2x256xf32> to vector<2xf32>
      %17 = vector.shape_cast %16 : vector<2xf32> to vector<2x1xf32>
      %18 = vector.broadcast %17 : vector<2x1xf32> to vector<2x256xf32>
      %19 = arith.subf %15, %18 : vector<2x256xf32>
      %20 = math.exp %19 : vector<2x256xf32>
      %cst_14 = arith.constant dense<0.000000e+00> : vector<2xf32>
      %21 = vector.multi_reduction <add>, %20, %cst_14 [1] : vector<2x256xf32> to vector<2xf32>
      %22 = vector.shape_cast %21 : vector<2xf32> to vector<2x1xf32>
      %23 = tpu.reciprocal %22 : vector<2x1xf32> -> vector<2x1xf32>
      %24 = vector.broadcast %23 : vector<2x1xf32> to vector<2x256xf32>
      %25 = arith.mulf %20, %24 : vector<2x256xf32>
      %c0_15 = arith.constant 0 : index
      %c0_16 = arith.constant 0 : index
      %26 = vector.load %arg6[%c0_15, %c0_16] : memref<2x256xf32, #tpu.memory_space<vmem>>, vector<2x256xf32>
      %cst_17 = arith.constant dense<0xFF800000> : vector<2xf32>
      %27 = vector.multi_reduction <maximumf>, %26, %cst_17 [1] : vector<2x256xf32> to vector<2xf32>
      %28 = vector.shape_cast %27 : vector<2xf32> to vector<2x1xf32>
      %29 = vector.broadcast %28 : vector<2x1xf32> to vector<2x256xf32>
      %30 = arith.subf %26, %29 : vector<2x256xf32>
      %31 = math.exp %30 : vector<2x256xf32>
      %cst_18 = arith.constant dense<0.000000e+00> : vector<2xf32>
      %32 = vector.multi_reduction <add>, %31, %cst_18 [1] : vector<2x256xf32> to vector<2xf32>
      %33 = vector.shape_cast %32 : vector<2xf32> to vector<2x1xf32>
      %34 = tpu.reciprocal %33 : vector<2x1xf32> -> vector<2x1xf32>
      %35 = vector.broadcast %34 : vector<2x1xf32> to vector<2x256xf32>
      %36 = arith.mulf %31, %35 : vector<2x256xf32>
      %37 = arith.subf %25, %36 : vector<2x256xf32>
      %38 = arith.mulf %37, %37 : vector<2x256xf32>
      %cst_19 = arith.constant dense<0.000000e+00> : vector<2xf32>
      %39 = vector.multi_reduction <add>, %38, %cst_19 [1] : vector<2x256xf32> to vector<2xf32>
      %40 = vector.shape_cast %39 : vector<2xf32> to vector<2x1xf32>
      %41 = vector.shape_cast %40 : vector<2x1xf32> to vector<2x1x1xf32>
      %42 = vector.shape_cast %41 : vector<2x1x1xf32> to vector<2x1x1xf32>
      %43 = vector.broadcast %42 : vector<2x1x1xf32> to vector<2x1x128xf32>
      %c0_20 = arith.constant 0 : index
      %c0_21 = arith.constant 0 : index
      %c0_22 = arith.constant 0 : index
      %44 = vector.load %arg4[%c0_20, %c0_21, %c0_22] : memref<2x1x128xf32, #tpu.memory_space<vmem>>, vector<2x1x128xf32>
      tpu.vector_store %arg4[%c0_20, %c0_21, %c0_22], %43 {strides = array<i32>} : memref<2x1x128xf32, #tpu.memory_space<vmem>>, vector<2x1x128xf32>,
    } else {
    }
    return
  }
  func.func @transform_0(%arg0: i32, %arg1: i32) -> (i32, i32, i32) {
    %c0_i32 = arith.constant 0 : i32
    %c0_i32_0 = arith.constant 0 : i32
    return %arg0, %arg1, %c0_i32 : i32, i32, i32
  }
  func.func @transform_1(%arg0: i32, %arg1: i32) -> (i32, i32, i32) {
    %c0_i32 = arith.constant 0 : i32
    %c0_i32_0 = arith.constant 0 : i32
    return %arg0, %arg1, %c0_i32 : i32, i32, i32
  }
  func.func @transform_2(%arg0: i32, %arg1: i32) -> (i32, i32, i32) {
    %c0_i32 = arith.constant 0 : i32
    %c0_i32_0 = arith.constant 0 : i32
    %c0_i32_1 = arith.constant 0 : i32
    return %arg0, %c0_i32, %c0_i32_0 : i32, i32, i32
  }
}

</mosaic_0001>

<bundles_post_ra>
// kernel: tpu_custom_call.1
= control target key start
LH: loop header
LB: loop body
LE: loop exit
PB: predicated region body
PF: predicated region fallthrough
CT: control target
= control target key end

     0   :  { %7 = vsyncpa [#allocation5], 0  ;;  %s609_s0 = inlined_call_operand.hbm [shape: f32[2,4,256], index: 0, kind: input, shape index: {}]   ;;  %s610_s1 = inlined_call_operand.hbm [shape: f32[2,4,256], index: 1, kind: input, shape index: {}]   ;;  %s611_s2 = inlined_call_operand.hbm [shape: f32[2,1,128], index: 2, kind: output, shape index: {}]  }
   0x1   :  { %8 = vsyncpa [#allocation8], 0 }
   0x2   :  { %9 = vsyncpa [#allocation6], 0  ;;  %s511_s9 = smov [#allocation4]   ;;  %s439_s13 = scalar_lea.hbm %s609_s0, 256 }
   0x3   :  { %s15_s10 = sshll.u32 %s511_s9, 4  ;;  %p440_p0 = scmp.ne.s32.totalorder %s609_s0, %s439_s13  ;;  %s16_s10 = int_to_ptr.vmem [resolvable:$true] %s15_s10 }
   0x4   :  { %p443_p1 = scmp.lt.u32.totalorder %s439_s13, %s609_s0 }
   0x6   :  { %p445_p2 = pnand %p443_p1, %p440_p0 }
   0x8   :  { %448 = shalt.err (!%p445_p2)
}
   0x9   :  { %s449_s18 = scalar_lea.vmem %s16_s10, 256  ;;  %p454_p4 = scmp.lt.s32.totalorder %s16_s10, %s16_s10 }
   0xa   :  { %p450_p3 = scmp.ne.s32.totalorder %s16_s10, %s449_s18  ;;  %p455_p5 = scmp.lt.s32.totalorder %s449_s18, %s449_s18 }
   0xc   :  { %p456_p6 = por %p455_p5, %p454_p4 }
   0xe   :  { %p457_p7 = pnand %p456_p6, %p450_p3 }
  0x10   :  { %460 = shalt.err (!%p457_p7)
}
  0x11   :  { %s512_s19 = smov 128   ;;  %s513_s20 = smov 8  }
  0x12   :  { %21 = dma.hbm_to_vmem [thread:$0]  %s609_s0, 256, %s16_s10, [#allocation5], %s512_s19, %s512_s19, %s513_s20  }
  0x13   :  { %s514_s23 = smov [#allocation7]   ;;  %s461_s27 = scalar_lea.hbm %s610_s1, 256 }
  0x14   :  { %s27_s24 = sshll.u32 %s514_s23, 4  ;;  %p462_p8 = scmp.ne.s32.totalorder %s610_s1, %s461_s27  ;;  %s28_s24 = int_to_ptr.vmem [resolvable:$true] %s27_s24 }
  0x15   :  { %p465_p9 = scmp.lt.u32.totalorder %s461_s27, %s610_s1 }
  0x17   :  { %p467_p10 = pnand %p465_p9, %p462_p8 }
  0x19   :  { %470 = shalt.err (!%p467_p10)
}
  0x1a   :  { %s471_s4 = scalar_lea.vmem %s28_s24, 256  ;;  %p476_p12 = scmp.lt.s32.totalorder %s28_s24, %s28_s24 }
  0x1b   :  { %p472_p11 = scmp.ne.s32.totalorder %s28_s24, %s471_s4  ;;  %p477_p13 = scmp.lt.s32.totalorder %s471_s4, %s471_s4 }
  0x1d   :  { %p478_p0 = por %p477_p13, %p476_p12 }
  0x1f   :  { %p479_p1 = pnand %p478_p0, %p472_p11 }
  0x21   :  { %482 = shalt.err (!%p479_p1)
}
  0x22   :  { %33 = dma.hbm_to_vmem [thread:$0]  %s610_s1, 256, %s28_s24, [#allocation8], %s512_s19, %s512_s19, %s513_s20  }
  0x23   :  { %505 = dma.done.wait [#allocation5], 256  }
  0x24   :  { %506 = vsyncadd [#allocation5], 4294967040 }
  0x25   :  { %507 = dma.done.wait [#allocation8], 256  }
  0x26   :  { %508 = vsyncadd [#allocation8], 4294967040  ;;  %v515_v0 = vmov 1983009808   ;;  %v129_v2 = vlaneseq  ;;  %v40_v3 = vld [vmem:[#allocation4] sm:$0xff]  ;;  %v41_v4 = vld [vmem:[#allocation4 + $0x8] sm:$0xff] }
  0x27   :  { %v559_v1 = vunpack.c.l.s4 %v515_v0  ;;  %v42_v5 = vld [vmem:[#allocation7] sm:$0xff]  ;;  %vm52_vm0 = vcmask 1043456   ;;  %v43_v6 = vld [vmem:[#allocation7 + $0x8] sm:$0xff]  ;;  %v44_v7 = vmul.f32 %v40_v3, %v40_v3  ;;  %v45_v8 = vmul.f32 %v41_v4, %v41_v4  ;;  %s517_s1 = smov [#allocation9]  }
  0x28   :  { %v81_v9 = vmul.f32 %v42_v5, %v42_v5  ;;  %v82_v10 = vmul.f32 %v43_v6, %v43_v6  ;;  %v562_v12 = vshrl.u32 %v129_v2, 7  ;;  %vm146_vm1 = vcmask 1041409   ;;  %s409_s6 = sshll.u32 %s517_s1, 4  ;;  %s410_s6 = int_to_ptr.vmem [resolvable:$true] %s409_s6 }
  0x29   :  { %v128_v11 = vunpack.c.0.s8 %v559_v1  ;;  %v48_v13 = vcombine.high %v44_v7, %v44_v7  ;;  %v49_v14 = vcombine.high %v45_v8, %v45_v8  ;;  %v53_v15 = vsel %vm52_vm0, %v44_v7, 0.0  ;;  %s483_s7 = scalar_lea.vmem %s410_s6, 32  ;;  %p488_p3 = scmp.lt.s32.totalorder %s410_s6, %s410_s6 }
  0x2a   :  { %v67_v16 = vsel %vm52_vm0, %v45_v8, 0.0  ;;  %v54_v17 = vrot.slane %v53_v15, 4  ;;  %v85_v19 = vcombine.high %v81_v9, %v81_v9  ;;  %v86_v20 = vcombine.high %v82_v10, %v82_v10  ;;  %p484_p2 = scmp.ne.s32.totalorder %s410_s6, %s483_s7  ;;  %p489_p4 = scmp.lt.s32.totalorder %s483_s7, %s483_s7 }
  0x2b   :  { %v68_v18 = vrot.slane %v67_v16, 4  ;;  %v60_v21 = vsel %vm52_vm0, %v48_v13, 0.0  ;;  %v74_v22 = vsel %vm52_vm0, %v49_v14, 0.0  ;;  %v89_v23 = vsel %vm52_vm0, %v81_v9, 0.0 }
  0x2c   :  { %v103_v24 = vsel %vm52_vm0, %v82_v10, 0.0  ;;  %v55_v25 = vadd.f32 %v54_v17, %v53_v15  ;;  %v61_v26 = vrot.slane %v60_v21, 4  ;;  %v75_v28 = vrot.slane %v74_v22, 4  ;;  %p490_p5 = por %p489_p4, %p488_p3 }
  0x2d   :  { %v69_v27 = vadd.f32 %v68_v18, %v67_v16  ;;  %v90_v29 = vrot.slane %v89_v23, 4  ;;  %v96_v30 = vsel %vm52_vm0, %v85_v19, 0.0  ;;  %v104_v31 = vrot.slane %v103_v24, 4 }
  0x2e   :  { %v110_v32 = vsel %vm52_vm0, %v86_v20, 0.0  ;;  %v56_v33 = vrot.slane %v55_v25, 2  ;;  %v62_v34 = vadd.f32 %v61_v26, %v60_v21  ;;  %v76_v36 = vadd.f32 %v75_v28, %v74_v22  ;;  %p491_p6 = pnand %p490_p5, %p484_p2 }
  0x2f   :  { %v70_v35 = vrot.slane %v69_v27, 2  ;;  %v91_v37 = vadd.f32 %v90_v29, %v89_v23  ;;  %v97_v38 = vrot.slane %v96_v30, 4  ;;  %v105_v39 = vadd.f32 %v104_v31, %v103_v24 }
  0x30   :  { %v111_v40 = vrot.slane %v110_v32, 4  ;;  %v57_v41 = vadd.f32 %v56_v33, %v55_v25  ;;  %v63_v42 = vrot.slane %v62_v34, 2  ;;  %v77_v44 = vrot.slane %v76_v36, 2 }
  0x31   :  { %v71_v43 = vadd.f32 %v70_v35, %v69_v27  ;;  %v92_v45 = vrot.slane %v91_v37, 2  ;;  %v98_v46 = vadd.f32 %v97_v38, %v96_v30  ;;  %v106_v47 = vrot.slane %v105_v39, 2 }
  0x32   :  { %v112_v48 = vadd.f32 %v111_v40, %v110_v32  ;;  %v58_v49 = vrot.slane %v57_v41, 1  ;;  %v64_v50 = vadd.f32 %v63_v42, %v62_v34  ;;  %v78_v52 = vadd.f32 %v77_v44, %v76_v36 }
  0x33   :  { %v72_v51 = vrot.slane %v71_v43, 1  ;;  %v93_v53 = vadd.f32 %v92_v45, %v91_v37  ;;  %v99_v54 = vrot.slane %v98_v46, 2  ;;  %v107_v55 = vadd.f32 %v106_v47, %v105_v39 }
  0x34   :  { %v113_v56 = vrot.slane %v112_v48, 2  ;;  %v59_v57 = vadd.f32 %v58_v49, %v57_v41  ;;  %v65_v58 = vrot.slane %v64_v50, 1  ;;  %v79_v60 = vrot.slane %v78_v52, 1 }
  0x35   :  { %v73_v59 = vadd.f32 %v72_v51, %v71_v43  ;;  %v94_v61 = vrot.slane %v93_v53, 1  ;;  %v100_v62 = vadd.f32 %v99_v54, %v98_v46  ;;  %v108_v63 = vrot.slane %v107_v55, 1 }
  0x36   :  { %v114_v0 = vadd.f32 %v113_v56, %v112_v48  ;;  %v66_v1 = vadd.f32 %v65_v58, %v64_v50  ;;  %v80_v2 = vadd.f32 %v79_v60, %v78_v52  ;;  %v573_v3 = vsub.s32 %v128_v11, %v562_v12 }
  0x37   :  { %v95_v4 = vadd.f32 %v94_v61, %v93_v53  ;;  %v101_v5 = vrot.slane %v100_v62, 1  ;;  %v109_v6 = vadd.f32 %v108_v63, %v107_v55  ;;  %vm148_vm2 = vcmask 1043459  }
  0x38   :  { %v115_v7 = vrot.slane %v114_v0, 1  ;;  %v125_v8 = vcombine.low %v59_v57, %v66_v1  ;;  %v133_v9 = vcombine.low %v73_v59, %v80_v2  ;;  %vm150_vm3 = vcmask 1045509  }
  0x39   :  { %v102_v10 = vadd.f32 %v101_v5, %v100_v62  ;;  %vm152_vm4 = vcmask 1047559   ;;  %vm272_vm5 = vcmask 1041408   ;;  %v516_v41 = vmov 269488144  }
  0x3a   :  { %v116_v13 = vadd.f32 %v115_v7, %v114_v0  ;;  %v132_v14 = vrot.slane %v125_v8, %v573_v3  ;;  %v140_v15 = vrot.slane %v133_v9, %v573_v3  ;;  %v280_v42 = vunpack.c.l.s4 %v516_v41 }
  0x3b   :  { %v160_v16 = vcombine.low %v95_v4, %v102_v10 }
  0x3c   :  { %v168_v17 = vcombine.low %v109_v6, %v116_v13  ;;  %v145_v18 = vrot.slane %v140_v15, 7  ;;  %v281_v43 = vunpack.c.0.s8 %v280_v42 }
  0x3d   :  { %v167_v11 = vrot.slane %v160_v16, %v573_v3 }
  0x3e   :  { %v175_v19 = vrot.slane %v168_v17, %v573_v3  ;;  %v147_v20 = vsel %vm146_vm1, %v145_v18, %v132_v14  ;;  %v284_v44 = vsub.s32 %v281_v43, %v562_v12 }
  0x3f   :  { %v149_v21 = vsel %vm148_vm2, %v145_v18, %v147_v20 }
  0x40   :  { %v178_v22 = vrot.slane %v175_v19, 7  ;;  %v151_v23 = vsel %vm150_vm3, %v145_v18, %v149_v21  ;;  %v398_v19 = vsub.s32 1, %v562_v12 }
  0x41   :  { %v153_v24 = vsel %vm152_vm4, %v145_v18, %v151_v23 }
  0x42   :  { %v179_v25 = vsel %vm146_vm1, %v178_v22, %v167_v11  ;;  %155 = vst [vmem:[#allocation2] sm:$0xf] %v153_v24  ;;  %v394_v11 = vsub.s32 0, %v562_v12 }
  0x43   :  { %v180_v26 = vsel %vm148_vm2, %v178_v22, %v179_v25 }
  0x44   :  { %v181_v27 = vsel %vm150_vm3, %v178_v22, %v180_v26 }
  0x45   :  { %v182_v28 = vsel %vm152_vm4, %v178_v22, %v181_v27 }
  0x46   :  { %184 = vst [vmem:[#allocation3] sm:$0xf] %v182_v28 }
  0x49   :  { %v260_v29 = vld [vmem:[#allocation2] sm:$0xf] }
  0x4a   :  { %v268_v30 = vrot.slane %v260_v29, %v573_v3 }
  0x4c   :  { %v269_v31 = vcombine.high %v268_v30, %v268_v30  ;;  %v273_v32 = vsel %vm272_vm5, %v268_v30, -inf }
  0x4d   :  { %v317_v33 = vld [vmem:[#allocation3] sm:$0xf] }
  0x4e   :  { %v325_v34 = vrot.slane %v317_v33, %v573_v3  ;;  %v274_v35 = vsel %vm272_vm5, %v269_v31, -inf }
  0x4f   :  { %v275_v36 = vmax.f32 %v273_v32, %v274_v35 }
  0x50   :  { %v326_v37 = vcombine.high %v325_v34, %v325_v34  ;;  %v329_v38 = vsel %vm272_vm5, %v325_v34, -inf }
  0x51   :  { %276 = vmax.xlane.f32.xlu0 %v275_v36 }
  0x52   :  { %v330_v39 = vsel %vm272_vm5, %v326_v37, -inf }
  0x53   :  { %v331_v40 = vmax.f32 %v329_v38, %v330_v39 }
  0x55   :  { %332 = vmax.xlane.f32.xlu0 %v331_v40 }
  0xde   :  { %v277_v45 = vpop.xlane.xlu0 %276 }
  0xdf   :  { %v285_v46 = vrot.slane %v277_v45, %v284_v44 }
  0xe1   :  { %v287_v47 = vsub.f32 %v260_v29, %v285_v46 }
  0xe2   :  { %v333_v48 = vpop.xlane.xlu0 %332 }
  0xe3   :  { %v288_v49 = vmul.f32 1.442695, %v287_v47  ;;  %v341_v50 = vrot.slane %v333_v48, %v284_v44 }
  0xe5   :  { %431 = vpow2.f32 %v288_v49  ;;  %v343_v51 = vsub.f32 %v317_v33, %v341_v50 }
  0xe7   :  { %v344_v52 = vmul.f32 1.442695, %v343_v51 }
  0xe9   :  { %433 = vpow2.f32 %v344_v52 }
  0xef   :  { %v432_v53 = vpop.eup %431 }
  0xf0   :  { %v297_v54 = vrot.slane %v432_v53, %v573_v3 }
  0xf2   :  { %v298_v55 = vcombine.high %v297_v54, %v297_v54  ;;  %v301_v57 = vsel %vm272_vm5, %v297_v54, 0.0 }
  0xf3   :  { %v434_v56 = vpop.eup %433 }
  0xf4   :  { %v302_v58 = vsel %vm272_vm5, %v298_v55, 0.0  ;;  %v353_v59 = vrot.slane %v434_v56, %v573_v3 }
  0xf5   :  { %v303_v60 = vadd.f32 %v302_v58, %v301_v57 }
  0xf6   :  { %v354_v61 = vcombine.high %v353_v59, %v353_v59  ;;  %v357_v62 = vsel %vm272_vm5, %v353_v59, 0.0 }
  0xf7   :  { %304 = vadd.xlane.f32.xlu1 %v303_v60 }
  0xf8   :  { %v358_v63 = vsel %vm272_vm5, %v354_v61, 0.0 }
  0xf9   :  { %v359_v0 = vadd.f32 %v358_v63, %v357_v62 }
  0xfb   :  { %360 = vadd.xlane.f32.xlu1 %v359_v0 }
 0x184   :  { %v305_v1 = vpop.xlane.xlu1 %304 }
 0x185   :  { %435 = vrcp.f32 %v305_v1 }
 0x188   :  { %v361_v2 = vpop.xlane.xlu1 %360 }
 0x189   :  { %437 = vrcp.f32 %v361_v2 }
 0x18f   :  { %v436_v4 = vpop.eup %435 }
 0x190   :  { %v314_v5 = vrot.slane %v436_v4, %v284_v44 }
 0x192   :  { %v316_v8 = vmul.f32 %v432_v53, %v314_v5 }
 0x193   :  { %v438_v6 = vpop.eup %437 }
 0x194   :  { %v370_v7 = vrot.slane %v438_v6, %v284_v44 }
 0x196   :  { %v372_v9 = vmul.f32 %v434_v56, %v370_v7 }
 0x198   :  { %v373_v10 = vsub.f32 %v316_v8, %v372_v9 }
 0x19a   :  { %v374_v13 = vmul.f32 %v373_v10, %v373_v10 }
 0x19c   :  { %v382_v14 = vrot.slane %v374_v13, %v573_v3 }
 0x19e   :  { %v383_v15 = vcombine.high %v382_v14, %v382_v14  ;;  %v386_v16 = vsel %vm272_vm5, %v382_v14, 0.0 }
 0x1a0   :  { %v387_v17 = vsel %vm272_vm5, %v383_v15, 0.0 }
 0x1a1   :  { %v388_v18 = vadd.f32 %v387_v17, %v386_v16 }
 0x1a3   :  { %389 = vadd.xlane.f32.xlu0 %v388_v18 }
 0x230   :  { %v390_v20 = vpop.xlane.xlu0 %389 }
 0x231   :  { %v395_v21 = vrot.slane %v390_v20, %v394_v11  ;;  %v399_v22 = vrot.slane %v390_v20, %v398_v19 }
 0x233   :  { %402 = vst [vmem:[#allocation9] sm:$0x1] %v395_v21  ;;  %403 = vst [vmem:[#allocation9 + $0x1] sm:$0x1] %v399_v22 }
 0x234   :  { %494 = shalt.err (!%p491_p6)
}
 0x235   :  { %s495_s10 = scalar_lea.hbm %s611_s2, 32 }
 0x236   :  { %p496_p7 = scmp.ne.s32.totalorder %s611_s2, %s495_s10  ;;  %p499_p8 = scmp.lt.u32.totalorder %s495_s10, %s611_s2 }
 0x238   :  { %p501_p9 = pnand %p499_p8, %p496_p7 }
 0x23a   :  { %504 = shalt.err (!%p501_p9)
}
 0x23b   :  { %s518_s15 = smov 16   ;;  %s519_s16 = smov 1  }
 0x23c   :  { %415 = dma.vmem_to_hbm [thread:$0]  %s410_s6, 32, %s611_s2, [#allocation6], %s518_s15, %s518_s15, %s519_s16  }
 0x23d   :  { %509 = dma.done.wait [#allocation6], 32  }
 0x23e   :  { %510 = vsyncadd [#allocation6], 4294967264 }
 0x23f   :  { %419 = vsyncpa [#allocation5], 1 }
 0x240   :  { %420 = vsyncpa [#allocation8], 1 }
 0x241   :  { %421 = vsyncpa [#allocation6], 1 }

</bundles_post_ra>
